<compile_context>
chip_gen: v5e
topology: v5e:2x2
jax: 0.10.0
libtpu: 0.0.40
codegen_flags: <defaults>
</compile_context>

<pallas_src>
import functools

import jax
import jax.numpy as jnp
from jax.experimental import pallas as pl
from jax.experimental.pallas import tpu as pltpu

LANE = 128              # batch granularity (lane width) for the streamed row
DEFAULT_TILE_B = 8192   # batch elements per grid step (working set ~ a few MiB)

IN_F, H1_F, H2_F, OUT_F = 1, 20, 40, 1
F1P = 32                # hidden1 (20) padded to a multiple of 8 sublanes
F2P = 40                # hidden2 (40) already a multiple of 8


def _round_up(n, m):
    return ((n + m - 1) // m) * m


def _pad2d(a, rows, cols):
    r, c = a.shape
    return jnp.pad(a, ((0, rows - r), (0, cols - c)))


def _mlp_kernel(x_ref, w1_ref, b1_ref, w2_ref, b2_ref, w3_ref, b3_ref, o_ref,
                *, mm_dtype):
    """Transposed MLP on one lane-dense batch tile.

    x_ref:  (1, TB)      batch on lanes
    h1:     (F1P, TB)    layer 1 (K=1) is a pure VPU broadcast
    h2:     (F2P, TB)    layer 2 is the only real MXU matmul (M=F2P, K=F1P, N=TB)
    out:    (1, TB)      layer 3 (N=1) is a (1,F2P)@(F2P,TB) MXU matmul
    """
    x = x_ref[...]                                                   # (1, TB)
    h1 = jnp.maximum(w1_ref[...] * x + b1_ref[...], 0.0)             # (F1P, TB) VPU
    h2 = jnp.dot(w2_ref[...].astype(mm_dtype), h1.astype(mm_dtype),
                 preferred_element_type=jnp.float32)                 # (F2P, TB) MXU
    h2 = jnp.maximum(h2 + b2_ref[...], 0.0)                          # VPU
    out = jnp.dot(w3_ref[...], h2,
                  preferred_element_type=jnp.float32)                # (1, TB)  MXU
    o_ref[...] = out + b3_ref[0]                                     # lane-dense store


def prepare_params(params):
    """Pad/transpose raw params ONCE for the transposed (feature-on-sublane) kernel.
    Raw weights are stored (in_features, out_features)."""
    w1, b1, w2, b2, w3, b3 = params
    return (
        _pad2d(w1.T, F1P, 1),                      # (F1P, 1)   w1 column
        _pad2d(b1.reshape(-1, 1), F1P, 1),         # (F1P, 1)   b1 column
        _pad2d(w2.T, F2P, F1P),                    # (F2P, F1P) W2^T (padded K lanes = 0)
        b2.reshape(-1, 1).astype(jnp.float32),     # (F2P, 1)   b2 column (40 = F2P)
        w3.T.astype(jnp.float32),                  # (1, F2P)   w3 row
        b3.reshape(1).astype(jnp.float32),         # (1,)       b3 scalar -> SMEM
    )


@functools.partial(jax.jit, static_argnames=("tile_b", "mm_dtype"))
def net_forward(x, padded_params, tile_b=None, mm_dtype=jnp.float32):
    """x: (B, 1) float32 -> (B, 1) float32, matching Net.forward."""
    w1c, b1c, w2t, b2c, w3r, b3 = padded_params
    B = x.shape[0]

    if tile_b is None:
        # Keep >= 2 grid steps when possible so v7x's two TensorCores both get work.
        tile_b = min(DEFAULT_TILE_B, _round_up(max(-(-B // 2), 1), LANE))
    else:
        # Robustness: caller-supplied tile sizes are rounded to a lane multiple.
        tile_b = _round_up(max(int(tile_b), 1), LANE)
    Bp = _round_up(B, tile_b)
    grid = (Bp // tile_b,)

    # Lane-dense slab: only the batch axis is padded, then laid out on lanes.
    x_row = jnp.pad(x, ((0, Bp - B), (0, 0))).reshape(1, Bp)

    stream = lambda i: (0, i)     # x / out: one lane-dense batch tile per step
    const = lambda i: (0, 0)      # weights / biases: VMEM-resident across steps

    cost = pl.CostEstimate(
        flops=2 * Bp * (IN_F * H1_F + H1_F * H2_F + H2_F * OUT_F),
        transcendentals=0,
        bytes_accessed=4 * (2 * Bp + 2 * F1P + F2P * F1P + 2 * F2P + F2P + 1),
    )

    out_row = pl.pallas_call(
        functools.partial(_mlp_kernel, mm_dtype=mm_dtype),
        out_shape=jax.ShapeDtypeStruct((1, Bp), jnp.float32),
        grid=grid,
        in_specs=[
            pl.BlockSpec((1, tile_b), stream),                   # x row (lane-dense)
            pl.BlockSpec((F1P, 1), const),                       # w1 column
            pl.BlockSpec((F1P, 1), const),                       # b1 column
            pl.BlockSpec((F2P, F1P), const),                     # W2^T
            pl.BlockSpec((F2P, 1), const),                       # b2 column
            pl.BlockSpec((1, F2P), const),                       # w3 row
            pl.BlockSpec(memory_space=pltpu.MemorySpace.SMEM),   # b3 scalar (no VMEM tile)
        ],
        out_specs=pl.BlockSpec((1, tile_b), stream),
        compiler_params=pltpu.CompilerParams(
            dimension_semantics=("parallel",),
            vmem_limit_bytes=48 * 1024 * 1024,   # headroom under v7x's 64 MiB VMEM
        ),
        cost_estimate=cost,
    )(x_row, w1c, b1c, w2t, b2c, w3r, b3)

    return out_row.reshape(Bp, 1)[:B]


def init_params(key):
    """Deterministic init mimicking nn.Linear shapes:
    fc1: (1->20), fc2: (20->40), fc3: (40->1). Stored as (in, out)."""
    k1, k2, k3, k4, k5, k6 = jax.random.split(key, 6)

    def uniform(k, shape, fan_in):
        bound = 1.0 / jnp.sqrt(jnp.float32(fan_in))
        return jax.random.uniform(k, shape, jnp.float32, -bound, bound)

    w1 = uniform(k1, (1, 20), 1)
    b1 = uniform(k2, (20,), 1)
    w2 = uniform(k3, (20, 40), 20)
    b2 = uniform(k4, (40,), 20)
    w3 = uniform(k5, (40, 1), 40)
    b3 = uniform(k6, (1,), 40)
    return (w1, b1, w2, b2, w3, b3)


def _reference(x, params):
    w1, b1, w2, b2, w3, b3 = params
    h1 = jnp.maximum(x @ w1 + b1, 0.0)
    h2 = jnp.maximum(h1 @ w2 + b2, 0.0)
    return h2 @ w3 + b3


if __name__ == "__main__":
    key = jax.random.PRNGKey(0)
    kp, kx1, kx2, kx3 = jax.random.split(key, 4)
    params = init_params(kp)
    padded = prepare_params(params)

    # Small batch of scalar inputs, shape (B, 1) as implied by nn.Linear(1, 20).
    x_small = jax.random.normal(kx1, (8, 1), dtype=jnp.float32)
    out_small = net_forward(x_small, padded)
    jax.block_until_ready(out_small)
    assert out_small.shape == (8, 1)
    assert jnp.allclose(out_small, _reference(x_small, params), atol=1e-5, rtol=1e-5)

    # Medium batch: default tiling gives >= 2 grid steps plus batch-tail padding.
    x_med = jax.random.normal(kx2, (300, 1), dtype=jnp.float32)
    out_med = net_forward(x_med, padded)
    jax.block_until_ready(out_med)
    assert out_med.shape == (300, 1)
    assert jnp.allclose(out_med, _reference(x_med, params), atol=1e-5, rtol=1e-5)

    # Explicit (non-multiple-of-128) tile_b exercises the rounding/validation path.
    x_big = jax.random.normal(kx3, (1024, 1), dtype=jnp.float32)
    out_big = net_forward(x_big, padded, tile_b=200)   # rounds to 256 -> grid of 4
    jax.block_until_ready(out_big)
    assert out_big.shape == (1024, 1)
    assert jnp.allclose(out_big, _reference(x_big, params), atol=1e-5, rtol=1e-5)

    # Optional bf16 middle matmul (primarily a v5e optimization): looser tolerance.
    out_bf16 = net_forward(x_med, padded, mm_dtype=jnp.bfloat16)
    jax.block_until_ready(out_bf16)
    assert jnp.allclose(out_bf16, _reference(x_med, params), atol=5e-2, rtol=5e-2)

    print("KERNEL_OK")
</pallas_src>

<mosaic_0001>
module attributes {stable_mosaic.version = 11 : i64} {
  func.func @_mlp_kernel(%arg0: i32, %arg1: memref<1x128xf32, #tpu.memory_space<vmem>>, %arg2: memref<32x1xf32, #tpu.memory_space<vmem>>, %arg3: memref<32x1xf32, #tpu.memory_space<vmem>>, %arg4: memref<40x32xf32, #tpu.memory_space<vmem>>, %arg5: memref<40x1xf32, #tpu.memory_space<vmem>>, %arg6: memref<1x40xf32, #tpu.memory_space<vmem>>, %arg7: memref<1xf32, #tpu.memory_space<smem>>, %arg8: memref<1x128xf32, #tpu.memory_space<vmem>>) attributes {dimension_semantics = [#tpu.dimension_semantics<parallel>], iteration_bounds = array<i64: 1>, scalar_prefetch = 0 : i64, scratch_operands = 0 : i64, tpu.core_type = #tpu.core_type<tc>, window_params = [{transform_indices = @transform_0, window_bounds = array<i64: 1, 128>}, {pipeline_mode = #tpu.pipeline_mode<synchronous>, transform_indices = @transform_1, window_bounds = array<i64: 32, 1>}, {pipeline_mode = #tpu.pipeline_mode<synchronous>, transform_indices = @transform_2, window_bounds = array<i64: 32, 1>}, {pipeline_mode = #tpu.pipeline_mode<synchronous>, transform_indices = @transform_3, window_bounds = array<i64: 40, 32>}, {pipeline_mode = #tpu.pipeline_mode<synchronous>, transform_indices = @transform_4, window_bounds = array<i64: 40, 1>}, {pipeline_mode = #tpu.pipeline_mode<synchronous>, transform_indices = @transform_5, window_bounds = array<i64: 1, 40>}, {transform_indices = @transform_6, window_bounds = array<i64: 1>}, {transform_indices = @transform_7, window_bounds = array<i64: 1, 128>}]} {
    %c0 = arith.constant 0 : index
    %c0_0 = arith.constant 0 : index
    %0 = vector.load %arg1[%c0, %c0_0] : memref<1x128xf32, #tpu.memory_space<vmem>>, vector<1x128xf32>
    %c0_1 = arith.constant 0 : index
    %c0_2 = arith.constant 0 : index
    %1 = vector.load %arg2[%c0_1, %c0_2] : memref<32x1xf32, #tpu.memory_space<vmem>>, vector<32x1xf32>
    %2 = vector.broadcast %1 : vector<32x1xf32> to vector<32x128xf32>
    %3 = vector.broadcast %0 : vector<1x128xf32> to vector<32x128xf32>
    %4 = arith.mulf %2, %3 : vector<32x128xf32>
    %c0_3 = arith.constant 0 : index
    %c0_4 = arith.constant 0 : index
    %5 = vector.load %arg3[%c0_3, %c0_4] : memref<32x1xf32, #tpu.memory_space<vmem>>, vector<32x1xf32>
    %6 = vector.broadcast %5 : vector<32x1xf32> to vector<32x128xf32>
    %7 = arith.addf %4, %6 : vector<32x128xf32>
    %cst = arith.constant 0.000000e+00 : f32
    %8 = vector.broadcast %cst : f32 to vector<32x128xf32>
    %9 = arith.maximumf %7, %8 : vector<32x128xf32>
    %c0_5 = arith.constant 0 : index
    %c0_6 = arith.constant 0 : index
    %10 = vector.load %arg4[%c0_5, %c0_6] : memref<40x32xf32, #tpu.memory_space<vmem>>, vector<40x32xf32>
    %cst_7 = arith.constant dense<0.000000e+00> : vector<40x128xf32>
    %11 = tpu.matmul %10, %9, %cst_7 {dimension_numbers = #tpu.dot_dimension_numbers<[1], [0], [0], [1], [0, 0, 1, 1], [], []>} : vector<40x32xf32>, vector<32x128xf32>, vector<40x128xf32> -> vector<40x128xf32>
    %c0_8 = arith.constant 0 : index
    %c0_9 = arith.constant 0 : index
    %12 = vector.load %arg5[%c0_8, %c0_9] : memref<40x1xf32, #tpu.memory_space<vmem>>, vector<40x1xf32>
    %13 = vector.broadcast %12 : vector<40x1xf32> to vector<40x128xf32>
    %14 = arith.addf %11, %13 : vector<40x128xf32>
    %cst_10 = arith.constant 0.000000e+00 : f32
    %15 = vector.broadcast %cst_10 : f32 to vector<40x128xf32>
    %16 = arith.maximumf %14, %15 : vector<40x128xf32>
    %c0_11 = arith.constant 0 : index
    %c0_12 = arith.constant 0 : index
    %17 = vector.load %arg6[%c0_11, %c0_12] : memref<1x40xf32, #tpu.memory_space<vmem>>, vector<1x40xf32>
    %cst_13 = arith.constant dense<0.000000e+00> : vector<1x128xf32>
    %18 = tpu.matmul %17, %16, %cst_13 {dimension_numbers = #tpu.dot_dimension_numbers<[1], [0], [0], [1], [0, 0, 1, 1], [], []>} : vector<1x40xf32>, vector<40x128xf32>, vector<1x128xf32> -> vector<1x128xf32>
    %c0_14 = arith.constant 0 : index
    %19 = memref.load %arg7[%c0_14] : memref<1xf32, #tpu.memory_space<smem>>
    %20 = vector.broadcast %19 : f32 to vector<1x128xf32>
    %21 = arith.addf %18, %20 : vector<1x128xf32>
    %c0_15 = arith.constant 0 : index
    %c0_16 = arith.constant 0 : index
    %22 = vector.load %arg8[%c0_15, %c0_16] : memref<1x128xf32, #tpu.memory_space<vmem>>, vector<1x128xf32>
    tpu.vector_store %arg8[%c0_15, %c0_16], %21 {strides = array<i32>} : memref<1x128xf32, #tpu.memory_space<vmem>>, vector<1x128xf32>,
    return
  }
  func.func @transform_0(%arg0: i32) -> (i32, i32) {
    %c0_i32 = arith.constant 0 : i32
    %c0_i32_0 = arith.constant 0 : i32
    return %c0_i32, %arg0 : i32, i32
  }
  func.func @transform_1(%arg0: i32) -> (i32, i32) {
    %c0_i32 = arith.constant 0 : i32
    %c0_i32_0 = arith.constant 0 : i32
    %c0_i32_1 = arith.constant 0 : i32
    return %c0_i32, %c0_i32_0 : i32, i32
  }
  func.func @transform_2(%arg0: i32) -> (i32, i32) {
    %c0_i32 = arith.constant 0 : i32
    %c0_i32_0 = arith.constant 0 : i32
    %c0_i32_1 = arith.constant 0 : i32
    return %c0_i32, %c0_i32_0 : i32, i32
  }
  func.func @transform_3(%arg0: i32) -> (i32, i32) {
    %c0_i32 = arith.constant 0 : i32
    %c0_i32_0 = arith.constant 0 : i32
    %c0_i32_1 = arith.constant 0 : i32
    return %c0_i32, %c0_i32_0 : i32, i32
  }
  func.func @transform_4(%arg0: i32) -> (i32, i32) {
    %c0_i32 = arith.constant 0 : i32
    %c0_i32_0 = arith.constant 0 : i32
    %c0_i32_1 = arith.constant 0 : i32
    return %c0_i32, %c0_i32_0 : i32, i32
  }
  func.func @transform_5(%arg0: i32) -> (i32, i32) {
    %c0_i32 = arith.constant 0 : i32
    %c0_i32_0 = arith.constant 0 : i32
    %c0_i32_1 = arith.constant 0 : i32
    return %c0_i32, %c0_i32_0 : i32, i32
  }
  func.func @transform_6(%arg0: i32) -> i32 {
    %c0_i32 = arith.constant 0 : i32
    %c0_i32_0 = arith.constant 0 : i32
    return %c0_i32 : i32
  }
  func.func @transform_7(%arg0: i32) -> (i32, i32) {
    %c0_i32 = arith.constant 0 : i32
    %c0_i32_0 = arith.constant 0 : i32
    return %c0_i32, %arg0 : i32, i32
  }
}

</mosaic_0001>

<bundles_post_ra>
// kernel: net_forward.1
= control target key start
LH: loop header
LB: loop body
LE: loop exit
PB: predicated region body
PF: predicated region fallthrough
CT: control target
= control target key end

     0   :  { %v230_v0 = vmov 0   ;;  %vm126_vm0 = vcmask 261120   ;;  %vm182_vm1 = vcmask 326656   ;;  %s337_s2 = inlined_call_operand.vmem [shape: f32[32,1], index: 2, kind: input, shape index: {}]   ;;  %s338_s1 = inlined_call_operand.vmem [shape: f32[32,1], index: 1, kind: input, shape index: {}]   ;;  %s339_s0 = inlined_call_operand.vmem [shape: f32[1,128], index: 0, kind: input, shape index: {}]   ;;  %s340_s4 = inlined_call_operand.vmem [shape: f32[40,1], index: 4, kind: input, shape index: {}]   ;;  %s341_s3 = inlined_call_operand.vmem [shape: f32[40,32], index: 3, kind: input, shape index: {}]   ;;  %s342_s5 = inlined_call_operand.vmem [shape: f32[1,40], index: 5, kind: input, shape index: {}]   ;;  %s343_s6 = inlined_call_operand.<no memory space> [shape: f32[1], index: 6, kind: input, shape index: {}]   ;;  %s344_s7 = inlined_call_operand.vmem [shape: f32[1,128], index: 7, kind: output, shape index: {}]  }
   0x1   :  { %227 = vset.pattern.permute.xlu1 %v230_v0  ;;  %226 = vset.pattern.permute.xlu0 %v230_v0  ;;  %v62_v1 = vld [vmem:[%s337_s2 + $0x18] sm:$0xff]  ;;  %v61_v3 = vld [vmem:[%s337_s2 + $0x10] sm:$0xff]  ;;  %v29_v5 = vld [vmem:[%s338_s1 + $0x8] sm:$0xff]  ;;  %v181_v61 = vstv %s343_s6 }
   0x2   :  { %v31_v2 = vld [vmem:[%s338_s1 + $0x18] sm:$0xff]  ;;  %80 = vperm.xlu1 %227, %v62_v1   ;;  %228 = vset.pattern.permute.xlu2 %v230_v0  ;;  %v30_v4 = vld [vmem:[%s338_s1 + $0x10] sm:$0xff]  ;;  %v28_v6 = vld [vmem:[%s338_s1] sm:$0xff] }
   0x3   :  { %49 = vperm.xlu0 %226, %v31_v2   ;;  %75 = vperm.xlu2 %228, %v61_v3   ;;  %v60_v7 = vld [vmem:[%s337_s2 + $0x8] sm:$0xff]  ;;  %v59_v8 = vld [vmem:[%s337_s2] sm:$0xff]  ;;  %v99_v10 = vld [vmem:[%s340_s4 + $0x18] sm:$0xff] }
   0x4   :  { %v100_v9 = vld [vmem:[%s340_s4 + $0x20] sm:$0xff]  ;;  %v98_v11 = vld [vmem:[%s340_s4 + $0x10] sm:$0xff]  ;;  %v97_v12 = vld [vmem:[%s340_s4 + $0x8] sm:$0xff] }
   0x5   :  { %v96_v13 = vld [vmem:[%s340_s4] sm:$0xff]  ;;  %v93_v36 = vld [vmem:[%s341_s3 + $0x10] sm:$0xff]  ;;  %v94_v37 = vld [vmem:[%s341_s3 + $0x18] sm:$0xff] }
   0x6   :  { %v229_v14 = vld [vmem:[%s339_s0] ss:$0 sm:$0xff]  ;;  %v92_v38 = vld [vmem:[%s341_s3 + $0x8] sm:$0xff] }
   0x7   :  { %v91_v35 = vld [vmem:[%s341_s3] sm:$0xff] }
   0x8   :  { %v95_v39 = vld [vmem:[%s341_s3 + $0x20] sm:$0xff] }
   0x9   :  { %v179_v60 = vld [vmem:[%s342_s5] sm:$0x1] }
   0xa   :  { %39 = vperm.xlu1 %227, %v29_v5  }
   0xb   :  { %44 = vperm.xlu0 %226, %v30_v4   ;;  %34 = vperm.xlu2 %228, %v28_v6  }
  0x12   :  { %65 = vperm.xlu1 %227, %v59_v8  }
  0x13   :  { %70 = vperm.xlu0 %226, %v60_v7   ;;  %123 = vperm.xlu2 %228, %v100_v9  }
  0x1a   :  { %113 = vperm.xlu1 %227, %v98_v11  }
  0x1b   :  { %118 = vperm.xlu0 %226, %v99_v10   ;;  %108 = vperm.xlu2 %228, %v97_v12  }
  0x23   :  { %103 = vperm.xlu0 %226, %v96_v13  }
  0x5d   :  { %v76_v19 = vpop.permute.xlu2 %75 }
  0x65   :  { %v35_v26 = vpop.permute.xlu2 %34 }
  0x66   :  { %v55_v27 = vmul.f32 %v229_v14, %v35_v26 }
  0x6d   :  { %v124_v42 = vpop.permute.xlu2 %123 }
  0x74   :  { %v81_v15 = vpop.permute.xlu1 %80 }
  0x75   :  { %v50_v16 = vpop.permute.xlu0 %49  ;;  %v109_v52 = vpop.permute.xlu2 %108 }
  0x76   :  { %v58_v17 = vmul.f32 %v229_v14, %v50_v16 }
  0x78   :  { %v86_v18 = vadd.f32 %v81_v15, %v58_v17 }
  0x7a   :  { %v90_v20 = vmax.f32 %v86_v18, 0.0 }
  0x7c   :  { %154 = vmatpush.msra.mxu0 %v90_v20  ;;  %217 = vmatpush.msra.mxu2 %v90_v20  ;;  %v40_v22 = vpop.permute.xlu1 %39 }
  0x7d   :  { %218 = vmatpush.msra.mxu3 %v90_v20  ;;  %v45_v21 = vpop.permute.xlu0 %44  ;;  %v56_v28 = vmul.f32 %v229_v14, %v40_v22 }
  0x7e   :  { %v57_v23 = vmul.f32 %v229_v14, %v45_v21 }
  0x80   :  { %v85_v24 = vadd.f32 %v76_v19, %v57_v23 }
  0x82   :  { %v89_v25 = vmax.f32 %v85_v24, 0.0 }
  0x84   :  { %155 = vmatpush.msra.mxu0 %v89_v25  ;;  %219 = vmatpush.msra.mxu2 %v89_v25  ;;  %v66_v30 = vpop.permute.xlu1 %65 }
  0x85   :  { %220 = vmatpush.msra.mxu3 %v89_v25  ;;  %v71_v29 = vpop.permute.xlu0 %70  ;;  %v83_v32 = vadd.f32 %v66_v30, %v55_v27 }
  0x86   :  { %v84_v31 = vadd.f32 %v71_v29, %v56_v28 }
  0x87   :  { %v87_v34 = vmax.f32 %v83_v32, 0.0 }
  0x88   :  { %v88_v33 = vmax.f32 %v84_v31, 0.0 }
  0x8a   :  { %156 = vmatpush.msra.mxu0 %v88_v33  ;;  %221 = vmatpush.msra.mxu2 %v88_v33 }
  0x8b   :  { %222 = vmatpush.msra.mxu3 %v88_v33 }
  0x8c   :  { %157 = vmatpush.msra.mxu0 %v87_v34  ;;  %223 = vmatpush.msra.mxu2 %v87_v34  ;;  %v114_v48 = vpop.permute.xlu1 %113 }
  0x8d   :  { %224 = vmatpush.msra.mxu3 %v87_v34  ;;  %211 = vmatmul.msk.f32.vlgmr.msra.gmra.mxu0 %vm126_vm0, %v91_v35  ;;  %v119_v43 = vpop.permute.xlu0 %118 }
  0x8e   :  { %213 = vmatmul.msk.f32.vlgmr.msra.gmra.mxu2 %vm126_vm0, %v93_v36  ;;  %214 = vmatmul.msk.f32.vlgmr.msra.gmra.mxu3 %vm126_vm0, %v94_v37 }
  0x95   :  { %212 = vmatmul.msk.f32.gmra.mxu0 %vm126_vm0, %v92_v38  ;;  %v104_v55 = vpop.permute.xlu0 %103 }
  0x96   :  { %215 = vmatmul.msk.f32.gmra.mxu3 %vm126_vm0, %v95_v39 }
 0x10a   :  { %v159_v40 = vpop.f32.mrf.mxu0 }
 0x10b   :  { %v160_v56 = vadd.f32 %v159_v40, %v104_v55 }
 0x10d   :  { %v174_v59 = vmax.f32 %v160_v56, 0.0 }
 0x111   :  { %v168_v41 = vpop.f32.mrf.mxu3  ;;  %v165_v44 = vpop.f32.mrf.mxu2 }
 0x112   :  { %v169_v46 = vadd.f32 %v168_v41, %v119_v43  ;;  %v162_v49 = vpop.f32.mrf.mxu0  ;;  %v166_v50 = vadd.f32 %v165_v44, %v114_v48 }
 0x113   :  { %v163_v54 = vadd.f32 %v162_v49, %v109_v52 }
 0x114   :  { %v177_v53 = vmax.f32 %v169_v46, 0.0  ;;  %v176_v57 = vmax.f32 %v166_v50, 0.0 }
 0x115   :  { %v175_v58 = vmax.f32 %v163_v54, 0.0 }
 0x119   :  { %v171_v45 = vpop.f32.mrf.mxu3 }
 0x11a   :  { %v172_v47 = vadd.f32 %v171_v45, %v124_v42 }
 0x11c   :  { %v178_v51 = vmax.f32 %v172_v47, 0.0 }
 0x11e   :  { %197 = vmatpush.msra.mxu1 %v178_v51 }
 0x120   :  { %198 = vmatpush.msra.mxu1 %v177_v53 }
 0x122   :  { %199 = vmatpush.msra.mxu1 %v176_v57 }
 0x124   :  { %200 = vmatpush.msra.mxu1 %v175_v58 }
 0x126   :  { %201 = vmatpush.msra.mxu1 %v174_v59 }
 0x127   :  { %216 = vmatmul.msk.f32.vlgmr.msra.gmra.mxu1 %vm182_vm1, %v179_v60 }
 0x1a4   :  { %v203_v62 = vpop.f32.mrf.mxu1 }
 0x1a5   :  { %v204_v63 = vadd.f32 %v203_v62, %v181_v61 }
 0x1a7   :  { %206 = vst [vmem:[%s344_s7] sm:$0x1] %v204_v63 }

</bundles_post_ra>
